<compile_context>
chip_gen: v5e
topology: v5e:2x2
jax: 0.10.0
libtpu: 0.0.40
codegen_flags: <defaults>
</compile_context>

<pallas_src>
import functools

import jax
import jax.numpy as jnp
from jax import lax
from jax.experimental import pallas as pl
from jax.experimental.pallas import tpu as pltpu

T2 = 0.05          # temperature (matches the PyTorch buffer)
EPS = 1e-05        # eps inside the log (matches PyTorch `eps`)
NORM_EPS = 1e-12   # F.normalize default eps
_INV_T2 = 1.0 / T2


def _pick_tile(n, pref, quantum):
    """Largest tile <= pref that divides n and is a multiple of `quantum`
    (falling back to the full extent n, which is always a legal block)."""
    if n <= pref:
        return n
    t = (pref // quantum) * quantum
    while t >= quantum:
        if n % t == 0:
            return t
        t -= quantum
    return n


def _normalize(f):
    # F.normalize(dim=1): x / max(||x||, eps)  ==  x * rsqrt(max(||x||^2, eps^2))
    ss = jnp.sum(f * f, axis=1, keepdims=True)
    return f * lax.rsqrt(jnp.maximum(ss, NORM_EPS * NORM_EPS))


def _scl_kernel(g_row_ref, g_col_ref,
                t_row_ref, t_col_ref, im_row_ref, im_col_ref,
                out_ref,
                t_rows, im_rows, nom_t, den_t, nom_i, den_i,
                *, tr, tc, n1, n0, mxu_dtype):
    i = pl.program_id(0)   # row-tile index   ("parallel")
    j = pl.program_id(1)   # col-tile index   ("arbitrary" reduction axis)

    @pl.when(j == 0)
    def _init():
        zeros = jnp.zeros((tr, 1), jnp.float32)
        nom_t[...] = zeros
        den_t[...] = zeros
        nom_i[...] = zeros
        den_i[...] = zeros
        # Normalize the row tiles once per row-tile and cache them; the row
        # blocks stay resident across the whole j sweep (index_map is
        # constant in j) so this removes all redundant rsqrt/mul work.
        t_rows[...] = _normalize(t_row_ref[...].astype(jnp.float32)).astype(mxu_dtype)
        im_rows[...] = _normalize(im_row_ref[...].astype(jnp.float32)).astype(mxu_dtype)

    # Masks for this (row-tile, col-tile) block, built from iota + the group
    # indicator vectors (no gathers, no full B x B materialization).
    row_g = i * tr + lax.broadcasted_iota(jnp.int32, (tr, tc), 0)
    col_g = j * tc + lax.broadcasted_iota(jnp.int32, (tr, tc), 1)
    not_diag = row_g != col_g
    same_group = g_row_ref[...] == g_col_ref[...]        # (tr,1)==(1,tc) -> (tr,tc)

    def accumulate(rows_scratch, col_ref, nom_ref, den_ref):
        fr = rows_scratch[...]
        fc = _normalize(col_ref[...].astype(jnp.float32)).astype(mxu_dtype)
        # cosine similarity of unit rows == dot product; trans_b contraction.
        sim = lax.dot_general(fr, fc, (((1,), (1,)), ((), ())),
                              preferred_element_type=jnp.float32)
        # Shift by the known max (1.0): ratio nom/denom is unchanged,
        # magnitudes stay <= 1 (epilogue remains fp32 on all chips).
        e = jnp.exp((sim - 1.0) * _INV_T2)
        e = jnp.where(not_diag, e, 0.0)                  # zero the diagonal
        den_ref[...] += jnp.sum(e, axis=1, keepdims=True)            # nom + cross
        nom_ref[...] += jnp.sum(jnp.where(same_group, e, 0.0),
                                axis=1, keepdims=True)               # same-group, off-diag

    accumulate(t_rows, t_col_ref, nom_t, den_t)
    accumulate(im_rows, im_col_ref, nom_i, den_i)

    @pl.when(j == pl.num_programs(1) - 1)
    def _finalize():
        per_row = (-jnp.log(nom_t[...] / den_t[...] + EPS)
                   - jnp.log(nom_i[...] / den_i[...] + EPS))
        g = g_row_ref[...]                                # (tr, 1) in {0,1}
        weight = g * (1.0 / n1) + (1.0 - g) * (1.0 / n0)
        out_ref[...] = per_row * weight


def supervised_contrastive_loss(text, image, label, num_type_1, num_type_0,
                                *, row_tile=256, col_tile=256,
                                use_bf16_matmul=False):
    """Equivalent of SupervisedContrastiveLoss(...).forward(text, image, label)."""
    B, D = text.shape
    tr = _pick_tile(B, row_tile, 8)      # row tile: multiple of 8 (or full B)
    tc = _pick_tile(B, col_tile, 128)    # col tile: multiple of 128 (or full B)
    ni, nj = B // tr, B // tc
    mxu_dtype = jnp.bfloat16 if use_bf16_matmul else jnp.float32

    # Glue: tiny (B,) group-indicator vector only -- no argsort, no gathers.
    g = (label != 0).astype(jnp.float32)
    g_row = g.reshape(B, 1)
    g_col = g.reshape(1, B)

    kernel = functools.partial(_scl_kernel, tr=tr, tc=tc,
                               n1=num_type_1, n0=num_type_0,
                               mxu_dtype=mxu_dtype)

    cost = pl.CostEstimate(
        flops=int(2 * 2 * B * B * D),                 # two B x B x D matmuls
        transcendentals=int(2 * B * B + 4 * B),       # exp + log + rsqrt
        bytes_accessed=int(4 * (2 * B * D + 2 * ni * B * D + 3 * B)),
    )

    per_row = pl.pallas_call(
        kernel,
        out_shape=jax.ShapeDtypeStruct((B, 1), jnp.float32),
        grid_spec=pltpu.PrefetchScalarGridSpec(
            num_scalar_prefetch=0,
            grid=(ni, nj),
            in_specs=[
                pl.BlockSpec((tr, 1), lambda i, j: (i, 0)),   # group of rows
                pl.BlockSpec((1, tc), lambda i, j: (0, j)),   # group of cols
                pl.BlockSpec((tr, D), lambda i, j: (i, 0)),   # text rows
                pl.BlockSpec((tc, D), lambda i, j: (j, 0)),   # text cols
                pl.BlockSpec((tr, D), lambda i, j: (i, 0)),   # image rows
                pl.BlockSpec((tc, D), lambda i, j: (j, 0)),   # image cols
            ],
            out_specs=pl.BlockSpec((tr, 1), lambda i, j: (i, 0)),
            scratch_shapes=[pltpu.VMEM((tr, D), mxu_dtype),      # normalized text rows
                            pltpu.VMEM((tr, D), mxu_dtype)]      # normalized image rows
                          + [pltpu.VMEM((tr, 1), jnp.float32)] * 4,
        ),
        compiler_params=pltpu.CompilerParams(
            dimension_semantics=("parallel", "arbitrary")),
        cost_estimate=cost,
    )(g_row, g_col, text, text, image, image)

    # Tiny reduction of the per-row weighted losses (B floats -> scalar).
    return jnp.sum(per_row)


def _reference(text, image, label, n1, n0):
    """Pure-JAX port of the PyTorch module, for a correctness sanity check."""
    def normalize(x):
        return x / jnp.maximum(jnp.linalg.norm(x, axis=1, keepdims=True), NORM_EPS)

    order = jnp.argsort(jnp.where(label != 0, 0, 1), stable=True)

    def compute(f):
        fs = f[order]
        ft1, ft0 = fs[:n1], fs[n1:]

        def cos(a, b):
            return normalize(a) @ normalize(b).T

        s11, s00 = cos(ft1, ft1), cos(ft0, ft0)
        s10, s01 = cos(ft1, ft0), cos(ft0, ft1)
        m1 = 1.0 - jnp.eye(n1, dtype=jnp.float32)
        m0 = 1.0 - jnp.eye(n0, dtype=jnp.float32)
        nom1 = jnp.sum(m1 * jnp.exp(s11 / T2), axis=1)
        nom0 = jnp.sum(m0 * jnp.exp(s00 / T2), axis=1)
        den1 = nom1 + jnp.sum(jnp.exp(s10 / T2), axis=1)
        den0 = nom0 + jnp.sum(jnp.exp(s01 / T2), axis=1)
        l1 = jnp.sum(-jnp.log(nom1 / den1 + EPS)) / n1
        l0 = jnp.sum(-jnp.log(nom0 / den0 + EPS)) / n0
        return l1 + l0

    return compute(normalize(text)) + compute(normalize(image))


if __name__ == "__main__":
    key = jax.random.PRNGKey(0)
    k_text, k_image = jax.random.split(key)

    # Small shapes consistent with the module: batch=8, hidden=32,
    # num_type_1=4, num_type_0=4.
    B, D = 8, 32
    n1, n0 = 4, 4
    label = jnp.array([1, 0, 1, 1, 0, 0, 1, 0], dtype=jnp.int32)  # 4 ones, 4 zeros
    text = jax.random.normal(k_text, (B, D), dtype=jnp.float32)
    image = jax.random.normal(k_image, (B, D), dtype=jnp.float32)

    loss = supervised_contrastive_loss(text, image, label, n1, n0)
    jax.block_until_ready(loss)

    ref = _reference(text, image, label, n1, n0)
    assert jnp.allclose(loss, ref, rtol=1e-4, atol=1e-4), (float(loss), float(ref))

    print("KERNEL_OK")
</pallas_src>

<mosaic_0001>
module attributes {stable_mosaic.version = 11 : i64} {
  func.func @_scl_kernel(%arg0: i32, %arg1: i32, %arg2: memref<8x1xf32, #tpu.memory_space<vmem>>, %arg3: memref<1x8xf32, #tpu.memory_space<vmem>>, %arg4: memref<8x32xf32, #tpu.memory_space<vmem>>, %arg5: memref<8x32xf32, #tpu.memory_space<vmem>>, %arg6: memref<8x32xf32, #tpu.memory_space<vmem>>, %arg7: memref<8x32xf32, #tpu.memory_space<vmem>>, %arg8: memref<8x1xf32, #tpu.memory_space<vmem>>, %arg9: memref<8x32xf32, #tpu.memory_space<vmem>>, %arg10: memref<8x32xf32, #tpu.memory_space<vmem>>, %arg11: memref<8x1xf32, #tpu.memory_space<vmem>>, %arg12: memref<8x1xf32, #tpu.memory_space<vmem>>, %arg13: memref<8x1xf32, #tpu.memory_space<vmem>>, %arg14: memref<8x1xf32, #tpu.memory_space<vmem>>) attributes {dimension_semantics = [#tpu.dimension_semantics<parallel>, #tpu.dimension_semantics<arbitrary>], iteration_bounds = array<i64: 1, 1>, scalar_prefetch = 0 : i64, scratch_operands = 6 : i64, tpu.core_type = #tpu.core_type<tc>, window_params = [{transform_indices = @transform_0, window_bounds = array<i64: 8, 1>}, {transform_indices = @transform_1, window_bounds = array<i64: 1, 8>}, {transform_indices = @transform_2, window_bounds = array<i64: 8, 32>}, {transform_indices = @transform_3, window_bounds = array<i64: 8, 32>}, {transform_indices = @transform_4, window_bounds = array<i64: 8, 32>}, {transform_indices = @transform_5, window_bounds = array<i64: 8, 32>}, {transform_indices = @transform_6, window_bounds = array<i64: 8, 1>}]} {
    %c0_i32 = arith.constant 0 : i32
    %0 = arith.cmpi eq, %arg1, %c0_i32 : i32
    %1 = arith.extui %0 : i1 to i32
    %c0_i32_0 = arith.constant 0 : i32
    %2 = arith.cmpi ne, %1, %c0_i32_0 : i32
    scf.if %2 {
      %cst_48 = arith.constant 0.000000e+00 : f32
      %80 = vector.broadcast %cst_48 : f32 to vector<8x1xf32>
      %c0_49 = arith.constant 0 : index
      %c0_50 = arith.constant 0 : index
      %81 = vector.load %arg11[%c0_49, %c0_50] : memref<8x1xf32, #tpu.memory_space<vmem>>, vector<8x1xf32>
      tpu.vector_store %arg11[%c0_49, %c0_50], %80 {strides = array<i32>} : memref<8x1xf32, #tpu.memory_space<vmem>>, vector<8x1xf32>,
      %c0_51 = arith.constant 0 : index
      %c0_52 = arith.constant 0 : index
      %82 = vector.load %arg12[%c0_51, %c0_52] : memref<8x1xf32, #tpu.memory_space<vmem>>, vector<8x1xf32>
      tpu.vector_store %arg12[%c0_51, %c0_52], %80 {strides = array<i32>} : memref<8x1xf32, #tpu.memory_space<vmem>>, vector<8x1xf32>,
      %c0_53 = arith.constant 0 : index
      %c0_54 = arith.constant 0 : index
      %83 = vector.load %arg13[%c0_53, %c0_54] : memref<8x1xf32, #tpu.memory_space<vmem>>, vector<8x1xf32>
      tpu.vector_store %arg13[%c0_53, %c0_54], %80 {strides = array<i32>} : memref<8x1xf32, #tpu.memory_space<vmem>>, vector<8x1xf32>,
      %c0_55 = arith.constant 0 : index
      %c0_56 = arith.constant 0 : index
      %84 = vector.load %arg14[%c0_55, %c0_56] : memref<8x1xf32, #tpu.memory_space<vmem>>, vector<8x1xf32>
      tpu.vector_store %arg14[%c0_55, %c0_56], %80 {strides = array<i32>} : memref<8x1xf32, #tpu.memory_space<vmem>>, vector<8x1xf32>,
      %c0_57 = arith.constant 0 : index
      %c0_58 = arith.constant 0 : index
      %85 = vector.load %arg4[%c0_57, %c0_58] : memref<8x32xf32, #tpu.memory_space<vmem>>, vector<8x32xf32>
      %86 = arith.mulf %85, %85 : vector<8x32xf32>
      %cst_59 = arith.constant dense<0.000000e+00> : vector<8xf32>
      %87 = vector.multi_reduction <add>, %86, %cst_59 [1] : vector<8x32xf32> to vector<8xf32>
      %88 = vector.shape_cast %87 : vector<8xf32> to vector<8x1xf32>
      %cst_60 = arith.constant 1.000000e-24 : f32
      %89 = vector.broadcast %cst_60 : f32 to vector<8x1xf32>
      %90 = arith.maximumf %88, %89 : vector<8x1xf32>
      %91 = math.rsqrt %90 : vector<8x1xf32>
      %92 = vector.broadcast %91 : vector<8x1xf32> to vector<8x32xf32>
      %93 = arith.mulf %85, %92 : vector<8x32xf32>
      %c0_61 = arith.constant 0 : index
      %c0_62 = arith.constant 0 : index
      %94 = vector.load %arg9[%c0_61, %c0_62] : memref<8x32xf32, #tpu.memory_space<vmem>>, vector<8x32xf32>
      tpu.vector_store %arg9[%c0_61, %c0_62], %93 {strides = array<i32>} : memref<8x32xf32, #tpu.memory_space<vmem>>, vector<8x32xf32>,
      %c0_63 = arith.constant 0 : index
      %c0_64 = arith.constant 0 : index
      %95 = vector.load %arg6[%c0_63, %c0_64] : memref<8x32xf32, #tpu.memory_space<vmem>>, vector<8x32xf32>
      %96 = arith.mulf %95, %95 : vector<8x32xf32>
      %cst_65 = arith.constant dense<0.000000e+00> : vector<8xf32>
      %97 = vector.multi_reduction <add>, %96, %cst_65 [1] : vector<8x32xf32> to vector<8xf32>
      %98 = vector.shape_cast %97 : vector<8xf32> to vector<8x1xf32>
      %cst_66 = arith.constant 1.000000e-24 : f32
      %99 = vector.broadcast %cst_66 : f32 to vector<8x1xf32>
      %100 = arith.maximumf %98, %99 : vector<8x1xf32>
      %101 = math.rsqrt %100 : vector<8x1xf32>
      %102 = vector.broadcast %101 : vector<8x1xf32> to vector<8x32xf32>
      %103 = arith.mulf %95, %102 : vector<8x32xf32>
      %c0_67 = arith.constant 0 : index
      %c0_68 = arith.constant 0 : index
      %104 = vector.load %arg10[%c0_67, %c0_68] : memref<8x32xf32, #tpu.memory_space<vmem>>, vector<8x32xf32>
      tpu.vector_store %arg10[%c0_67, %c0_68], %103 {strides = array<i32>} : memref<8x32xf32, #tpu.memory_space<vmem>>, vector<8x32xf32>,
    } else {
    }
    %c8_i32 = arith.constant 8 : i32
    %3 = arith.muli %arg0, %c8_i32 : i32
    %4 = tpu.iota {dimensions = array<i32: 0>} : vector<8x8xi32>
    %5 = vector.broadcast %3 : i32 to vector<8x8xi32>
    %6 = arith.addi %5, %4 : vector<8x8xi32>
    %c8_i32_1 = arith.constant 8 : i32
    %7 = arith.muli %arg1, %c8_i32_1 : i32
    %8 = tpu.iota {dimensions = array<i32: 1>} : vector<8x8xi32>
    %9 = vector.broadcast %7 : i32 to vector<8x8xi32>
    %10 = arith.addi %9, %8 : vector<8x8xi32>
    %11 = arith.cmpi ne, %6, %10 : vector<8x8xi32>
    %c0 = arith.constant 0 : index
    %c0_2 = arith.constant 0 : index
    %12 = vector.load %arg2[%c0, %c0_2] : memref<8x1xf32, #tpu.memory_space<vmem>>, vector<8x1xf32>
    %c0_3 = arith.constant 0 : index
    %c0_4 = arith.constant 0 : index
    %13 = vector.load %arg3[%c0_3, %c0_4] : memref<1x8xf32, #tpu.memory_space<vmem>>, vector<1x8xf32>
    %14 = vector.broadcast %12 : vector<8x1xf32> to vector<8x8xf32>
    %15 = vector.broadcast %13 : vector<1x8xf32> to vector<8x8xf32>
    %16 = arith.cmpf oeq, %14, %15 : vector<8x8xf32>
    %c0_5 = arith.constant 0 : index
    %c0_6 = arith.constant 0 : index
    %17 = vector.load %arg9[%c0_5, %c0_6] : memref<8x32xf32, #tpu.memory_space<vmem>>, vector<8x32xf32>
    %c0_7 = arith.constant 0 : index
    %c0_8 = arith.constant 0 : index
    %18 = vector.load %arg5[%c0_7, %c0_8] : memref<8x32xf32, #tpu.memory_space<vmem>>, vector<8x32xf32>
    %19 = arith.mulf %18, %18 : vector<8x32xf32>
    %cst = arith.constant dense<0.000000e+00> : vector<8xf32>
    %20 = vector.multi_reduction <add>, %19, %cst [1] : vector<8x32xf32> to vector<8xf32>
    %21 = vector.shape_cast %20 : vector<8xf32> to vector<8x1xf32>
    %cst_9 = arith.constant 1.000000e-24 : f32
    %22 = vector.broadcast %cst_9 : f32 to vector<8x1xf32>
    %23 = arith.maximumf %21, %22 : vector<8x1xf32>
    %24 = math.rsqrt %23 : vector<8x1xf32>
    %25 = vector.broadcast %24 : vector<8x1xf32> to vector<8x32xf32>
    %26 = arith.mulf %18, %25 : vector<8x32xf32>
    %cst_10 = arith.constant dense<0.000000e+00> : vector<8x8xf32>
    %27 = tpu.matmul %17, %26, %cst_10 {dimension_numbers = #tpu.dot_dimension_numbers<[1], [1], [0], [0], [0, 0, 1, 0], [], []>} : vector<8x32xf32>, vector<8x32xf32>, vector<8x8xf32> -> vector<8x8xf32>
    %cst_11 = arith.constant 1.000000e+00 : f32
    %28 = vector.broadcast %cst_11 : f32 to vector<8x8xf32>
    %29 = arith.subf %27, %28 : vector<8x8xf32>
    %cst_12 = arith.constant 2.000000e+01 : f32
    %30 = vector.broadcast %cst_12 : f32 to vector<8x8xf32>
    %31 = arith.mulf %29, %30 : vector<8x8xf32>
    %32 = math.exp %31 : vector<8x8xf32>
    %cst_13 = arith.constant 0.000000e+00 : f32
    %33 = vector.broadcast %cst_13 : f32 to vector<8x8xf32>
    %34 = arith.select %11, %32, %33 : vector<8x8xi1>, vector<8x8xf32>
    %c0_14 = arith.constant 0 : index
    %c0_15 = arith.constant 0 : index
    %35 = vector.load %arg12[%c0_14, %c0_15] : memref<8x1xf32, #tpu.memory_space<vmem>>, vector<8x1xf32>
    %cst_16 = arith.constant dense<0.000000e+00> : vector<8xf32>
    %36 = vector.multi_reduction <add>, %34, %cst_16 [1] : vector<8x8xf32> to vector<8xf32>
    %37 = vector.shape_cast %36 : vector<8xf32> to vector<8x1xf32>
    %38 = arith.addf %35, %37 : vector<8x1xf32>
    %c0_17 = arith.constant 0 : index
    %c0_18 = arith.constant 0 : index
    %39 = vector.load %arg12[%c0_17, %c0_18] : memref<8x1xf32, #tpu.memory_space<vmem>>, vector<8x1xf32>
    tpu.vector_store %arg12[%c0_17, %c0_18], %38 {strides = array<i32>} : memref<8x1xf32, #tpu.memory_space<vmem>>, vector<8x1xf32>,
    %c0_19 = arith.constant 0 : index
    %c0_20 = arith.constant 0 : index
    %40 = vector.load %arg11[%c0_19, %c0_20] : memref<8x1xf32, #tpu.memory_space<vmem>>, vector<8x1xf32>
    %cst_21 = arith.constant 0.000000e+00 : f32
    %41 = vector.broadcast %cst_21 : f32 to vector<8x8xf32>
    %42 = arith.select %16, %34, %41 : vector<8x8xi1>, vector<8x8xf32>
    %cst_22 = arith.constant dense<0.000000e+00> : vector<8xf32>
    %43 = vector.multi_reduction <add>, %42, %cst_22 [1] : vector<8x8xf32> to vector<8xf32>
    %44 = vector.shape_cast %43 : vector<8xf32> to vector<8x1xf32>
    %45 = arith.addf %40, %44 : vector<8x1xf32>
    %c0_23 = arith.constant 0 : index
    %c0_24 = arith.constant 0 : index
    %46 = vector.load %arg11[%c0_23, %c0_24] : memref<8x1xf32, #tpu.memory_space<vmem>>, vector<8x1xf32>
    tpu.vector_store %arg11[%c0_23, %c0_24], %45 {strides = array<i32>} : memref<8x1xf32, #tpu.memory_space<vmem>>, vector<8x1xf32>,
    %c0_25 = arith.constant 0 : index
    %c0_26 = arith.constant 0 : index
    %47 = vector.load %arg10[%c0_25, %c0_26] : memref<8x32xf32, #tpu.memory_space<vmem>>, vector<8x32xf32>
    %c0_27 = arith.constant 0 : index
    %c0_28 = arith.constant 0 : index
    %48 = vector.load %arg7[%c0_27, %c0_28] : memref<8x32xf32, #tpu.memory_space<vmem>>, vector<8x32xf32>
    %49 = arith.mulf %48, %48 : vector<8x32xf32>
    %cst_29 = arith.constant dense<0.000000e+00> : vector<8xf32>
    %50 = vector.multi_reduction <add>, %49, %cst_29 [1] : vector<8x32xf32> to vector<8xf32>
    %51 = vector.shape_cast %50 : vector<8xf32> to vector<8x1xf32>
    %cst_30 = arith.constant 1.000000e-24 : f32
    %52 = vector.broadcast %cst_30 : f32 to vector<8x1xf32>
    %53 = arith.maximumf %51, %52 : vector<8x1xf32>
    %54 = math.rsqrt %53 : vector<8x1xf32>
    %55 = vector.broadcast %54 : vector<8x1xf32> to vector<8x32xf32>
    %56 = arith.mulf %48, %55 : vector<8x32xf32>
    %cst_31 = arith.constant dense<0.000000e+00> : vector<8x8xf32>
    %57 = tpu.matmul %47, %56, %cst_31 {dimension_numbers = #tpu.dot_dimension_numbers<[1], [1], [0], [0], [0, 0, 1, 0], [], []>} : vector<8x32xf32>, vector<8x32xf32>, vector<8x8xf32> -> vector<8x8xf32>
    %cst_32 = arith.constant 1.000000e+00 : f32
    %58 = vector.broadcast %cst_32 : f32 to vector<8x8xf32>
    %59 = arith.subf %57, %58 : vector<8x8xf32>
    %cst_33 = arith.constant 2.000000e+01 : f32
    %60 = vector.broadcast %cst_33 : f32 to vector<8x8xf32>
    %61 = arith.mulf %59, %60 : vector<8x8xf32>
    %62 = math.exp %61 : vector<8x8xf32>
    %cst_34 = arith.constant 0.000000e+00 : f32
    %63 = vector.broadcast %cst_34 : f32 to vector<8x8xf32>
    %64 = arith.select %11, %62, %63 : vector<8x8xi1>, vector<8x8xf32>
    %c0_35 = arith.constant 0 : index
    %c0_36 = arith.constant 0 : index
    %65 = vector.load %arg14[%c0_35, %c0_36] : memref<8x1xf32, #tpu.memory_space<vmem>>, vector<8x1xf32>
    %cst_37 = arith.constant dense<0.000000e+00> : vector<8xf32>
    %66 = vector.multi_reduction <add>, %64, %cst_37 [1] : vector<8x8xf32> to vector<8xf32>
    %67 = vector.shape_cast %66 : vector<8xf32> to vector<8x1xf32>
    %68 = arith.addf %65, %67 : vector<8x1xf32>
    %c0_38 = arith.constant 0 : index
    %c0_39 = arith.constant 0 : index
    %69 = vector.load %arg14[%c0_38, %c0_39] : memref<8x1xf32, #tpu.memory_space<vmem>>, vector<8x1xf32>
    tpu.vector_store %arg14[%c0_38, %c0_39], %68 {strides = array<i32>} : memref<8x1xf32, #tpu.memory_space<vmem>>, vector<8x1xf32>,
    %c0_40 = arith.constant 0 : index
    %c0_41 = arith.constant 0 : index
    %70 = vector.load %arg13[%c0_40, %c0_41] : memref<8x1xf32, #tpu.memory_space<vmem>>, vector<8x1xf32>
    %cst_42 = arith.constant 0.000000e+00 : f32
    %71 = vector.broadcast %cst_42 : f32 to vector<8x8xf32>
    %72 = arith.select %16, %64, %71 : vector<8x8xi1>, vector<8x8xf32>
    %cst_43 = arith.constant dense<0.000000e+00> : vector<8xf32>
    %73 = vector.multi_reduction <add>, %72, %cst_43 [1] : vector<8x8xf32> to vector<8xf32>
    %74 = vector.shape_cast %73 : vector<8xf32> to vector<8x1xf32>
    %75 = arith.addf %70, %74 : vector<8x1xf32>
    %c0_44 = arith.constant 0 : index
    %c0_45 = arith.constant 0 : index
    %76 = vector.load %arg13[%c0_44, %c0_45] : memref<8x1xf32, #tpu.memory_space<vmem>>, vector<8x1xf32>
    tpu.vector_store %arg13[%c0_44, %c0_45], %75 {strides = array<i32>} : memref<8x1xf32, #tpu.memory_space<vmem>>, vector<8x1xf32>,
    %c0_i32_46 = arith.constant 0 : i32
    %77 = arith.cmpi eq, %arg1, %c0_i32_46 : i32
    %78 = arith.extui %77 : i1 to i32
    %c0_i32_47 = arith.constant 0 : i32
    %79 = arith.cmpi ne, %78, %c0_i32_47 : i32
    scf.if %79 {
      %c0_48 = arith.constant 0 : index
      %c0_49 = arith.constant 0 : index
      %80 = vector.load %arg11[%c0_48, %c0_49] : memref<8x1xf32, #tpu.memory_space<vmem>>, vector<8x1xf32>
      %c0_50 = arith.constant 0 : index
      %c0_51 = arith.constant 0 : index
      %81 = vector.load %arg12[%c0_50, %c0_51] : memref<8x1xf32, #tpu.memory_space<vmem>>, vector<8x1xf32>
      %82 = arith.divf %80, %81 : vector<8x1xf32>
      %cst_52 = arith.constant 9.99999974E-6 : f32
      %83 = vector.broadcast %cst_52 : f32 to vector<8x1xf32>
      %84 = arith.addf %82, %83 : vector<8x1xf32>
      %85 = math.log %84 : vector<8x1xf32>
      %cst_53 = arith.constant 0.000000e+00 : f32
      %86 = vector.broadcast %cst_53 : f32 to vector<8x1xf32>
      %87 = arith.subf %86, %85 : vector<8x1xf32>
      %c0_54 = arith.constant 0 : index
      %c0_55 = arith.constant 0 : index
      %88 = vector.load %arg13[%c0_54, %c0_55] : memref<8x1xf32, #tpu.memory_space<vmem>>, vector<8x1xf32>
      %c0_56 = arith.constant 0 : index
      %c0_57 = arith.constant 0 : index
      %89 = vector.load %arg14[%c0_56, %c0_57] : memref<8x1xf32, #tpu.memory_space<vmem>>, vector<8x1xf32>
      %90 = arith.divf %88, %89 : vector<8x1xf32>
      %cst_58 = arith.constant 9.99999974E-6 : f32
      %91 = vector.broadcast %cst_58 : f32 to vector<8x1xf32>
      %92 = arith.addf %90, %91 : vector<8x1xf32>
      %93 = math.log %92 : vector<8x1xf32>
      %94 = arith.subf %87, %93 : vector<8x1xf32>
      %c0_59 = arith.constant 0 : index
      %c0_60 = arith.constant 0 : index
      %95 = vector.load %arg2[%c0_59, %c0_60] : memref<8x1xf32, #tpu.memory_space<vmem>>, vector<8x1xf32>
      %cst_61 = arith.constant 2.500000e-01 : f32
      %96 = vector.broadcast %cst_61 : f32 to vector<8x1xf32>
      %97 = arith.mulf %95, %96 : vector<8x1xf32>
      %cst_62 = arith.constant 1.000000e+00 : f32
      %98 = vector.broadcast %cst_62 : f32 to vector<8x1xf32>
      %99 = arith.subf %98, %95 : vector<8x1xf32>
      %cst_63 = arith.constant 2.500000e-01 : f32
      %100 = vector.broadcast %cst_63 : f32 to vector<8x1xf32>
      %101 = arith.mulf %99, %100 : vector<8x1xf32>
      %102 = arith.addf %97, %101 : vector<8x1xf32>
      %103 = arith.mulf %94, %102 : vector<8x1xf32>
      %c0_64 = arith.constant 0 : index
      %c0_65 = arith.constant 0 : index
      %104 = vector.load %arg8[%c0_64, %c0_65] : memref<8x1xf32, #tpu.memory_space<vmem>>, vector<8x1xf32>
      tpu.vector_store %arg8[%c0_64, %c0_65], %103 {strides = array<i32>} : memref<8x1xf32, #tpu.memory_space<vmem>>, vector<8x1xf32>,
    } else {
    }
    return
  }
  func.func @transform_0(%arg0: i32, %arg1: i32) -> (i32, i32) {
    %c0_i32 = arith.constant 0 : i32
    %c0_i32_0 = arith.constant 0 : i32
    return %arg0, %c0_i32 : i32, i32
  }
  func.func @transform_1(%arg0: i32, %arg1: i32) -> (i32, i32) {
    %c0_i32 = arith.constant 0 : i32
    %c0_i32_0 = arith.constant 0 : i32
    return %c0_i32, %arg1 : i32, i32
  }
  func.func @transform_2(%arg0: i32, %arg1: i32) -> (i32, i32) {
    %c0_i32 = arith.constant 0 : i32
    %c0_i32_0 = arith.constant 0 : i32
    return %arg0, %c0_i32 : i32, i32
  }
  func.func @transform_3(%arg0: i32, %arg1: i32) -> (i32, i32) {
    %c0_i32 = arith.constant 0 : i32
    %c0_i32_0 = arith.constant 0 : i32
    return %arg1, %c0_i32 : i32, i32
  }
  func.func @transform_4(%arg0: i32, %arg1: i32) -> (i32, i32) {
    %c0_i32 = arith.constant 0 : i32
    %c0_i32_0 = arith.constant 0 : i32
    return %arg0, %c0_i32 : i32, i32
  }
  func.func @transform_5(%arg0: i32, %arg1: i32) -> (i32, i32) {
    %c0_i32 = arith.constant 0 : i32
    %c0_i32_0 = arith.constant 0 : i32
    return %arg1, %c0_i32 : i32, i32
  }
  func.func @transform_6(%arg0: i32, %arg1: i32) -> (i32, i32) {
    %c0_i32 = arith.constant 0 : i32
    %c0_i32_0 = arith.constant 0 : i32
    return %arg0, %c0_i32 : i32, i32
  }
}

</mosaic_0001>

<bundles_post_ra>
// kernel: tpu_custom_call.1
= control target key start
LH: loop header
LB: loop body
LE: loop exit
PB: predicated region body
PF: predicated region fallthrough
CT: control target
= control target key end

     0   :  { %11 = vsyncpa [#allocation9], 0  ;;  %s522_s0 = inlined_call_operand.vmem [shape: f32[8,1], index: 0, kind: input, shape index: {}]   ;;  %s523_s1 = inlined_call_operand.vmem [shape: f32[1,8], index: 1, kind: input, shape index: {}]   ;;  %s524_s2 = inlined_call_operand.vmem [shape: f32[8,32], index: 2, kind: input, shape index: {}]   ;;  %s525_s3 = inlined_call_operand.hbm [shape: f32[8,32], index: 3, kind: input, shape index: {}]   ;;  %s526_s4 = inlined_call_operand.hbm [shape: f32[8,32], index: 4, kind: input, shape index: {}]   ;;  %s527_s5 = inlined_call_operand.hbm [shape: f32[8,32], index: 5, kind: input, shape index: {}]   ;;  %s528_s6 = inlined_call_operand.vmem [shape: f32[8,1], index: 6, kind: output, shape index: {}]  }
   0x1   :  { %12 = vsyncpa [#allocation11], 0  ;;  %s35_s23 = sshll.u32 %s526_s4, 4  ;;  %s427_s24 = smov [#allocation10]   ;;  %s36_s23 = int_to_ptr.hbm [resolvable:$true] %s35_s23 }
   0x2   :  { %s37_s25 = sshll.u32 %s427_s24, 4  ;;  %s24_s28 = sshll.u32 %s525_s3, 4  ;;  %s38_s25 = int_to_ptr.vmem [resolvable:$true] %s37_s25  ;;  %s25_s28 = int_to_ptr.hbm [resolvable:$true] %s24_s28 }
   0x3   :  { %40 = dma.hbm_to_vmem [thread:$0]  %s36_s23, 128, %s38_s25, [#allocation11]  }
   0x4   :  { %s428_s29 = smov [#allocation8]   ;;  %s46_s9 = sshll.u32 %s527_s5, 4  ;;  %s47_s9 = int_to_ptr.hbm [resolvable:$true] %s46_s9 }
   0x5   :  { %s26_s30 = sshll.u32 %s428_s29, 4  ;;  %s429_s4 = smov [#allocation12]   ;;  %s27_s30 = int_to_ptr.vmem [resolvable:$true] %s26_s30 }
   0x6   :  { %29 = dma.hbm_to_vmem [thread:$0]  %s25_s28, 128, %s27_s30, [#allocation9]  }
   0x7   :  { %s48_s10 = sshll.u32 %s429_s4, 4  ;;  %s49_s10 = int_to_ptr.vmem [resolvable:$true] %s48_s10 }
   0x8   :  { %51 = dma.hbm_to_vmem [thread:$0]  %s47_s9, 128, %s49_s10, [#allocation11]  }
   0x9   :  { %423 = dma.done.wait [#allocation9], 128  }
   0xa   :  { %424 = vsyncadd [#allocation9], 4294967168 }
   0xb   :  { %425 = dma.done.wait [#allocation11], 256  }
   0xc   :  { %426 = vsyncadd [#allocation11], 4294967040  ;;  %vm75_vm0 = vcmask 261120   ;;  %v133_v0 = vld [vmem:[#allocation8] sm:$0xff]  ;;  %v73_v1 = vld [vmem:[%s524_s2] sm:$0xff]  ;;  %v430_v22 = vmov 0   ;;  %v111_v60 = vlaneseq }
   0xd   :  { %v134_v2 = vmul.f32 %v133_v0, %v133_v0  ;;  %v74_v3 = vmul.f32 %v73_v1, %v73_v1  ;;  %v479_v4 = vld [vmem:[#allocation12] sm:$0xff]  ;;  %v481_v5 = vld [vmem:[#allocation10] sm:$0xff]  ;;  %328 = vset.pattern.permute.xlu2 %v430_v22  ;;  %329 = vset.pattern.permute.xlu0 %v430_v22  ;;  %vm68_vm13 = vcmask 7168   ;;  %v431_v58 = vmov 0.0  }
   0xe   :  { %v199_v8 = vmul.f32 %v479_v4, %v479_v4  ;;  %v93_v9 = vmul.f32 %v481_v5, %v481_v5  ;;  %v494_v18 = vld [vmem:[%s522_s0] sm:$0xff]  ;;  %70 = vst.msk [vmem:[#allocation5] sm:$0xff] %vm68_vm13, %v431_v58  ;;  %v112_v62 = vshrl.u32 %v111_v60, 7  ;;  %v117_v63 = vand.u32 127, %v111_v60 }
   0xf   :  { %v136_v6 = vsel %vm75_vm0, %v134_v2, 0.0  ;;  %v76_v7 = vsel %vm75_vm0, %v74_v3, 0.0  ;;  %125 = vperm.xlu2 %328, %v494_v18   ;;  %69 = vst.msk [vmem:[#allocation4] sm:$0xff] %vm68_vm13, %v431_v58  ;;  %v305_v60 = vmul.f32 0.25, %v494_v18 }
  0x10   :  { %137 = vadd.xlane.f32.xlu1 %v136_v6  ;;  %77 = vadd.xlane.f32.xlu0 %v76_v7  ;;  %v200_v10 = vsel %vm75_vm0, %v199_v8, 0.0  ;;  %v94_v11 = vsel %vm75_vm0, %v93_v9, 0.0  ;;  %71 = vst.msk [vmem:[#allocation6] sm:$0xff] %vm68_vm13, %v431_v58  ;;  %vm120_vm14 = vcmp.ne.s32.totalorder %v112_v62, %v117_v63 }
  0x11   :  { %72 = vst.msk [vmem:[#allocation7] sm:$0xff] %vm68_vm13, %v431_v58 }
  0x18   :  { %201 = vadd.xlane.f32.xlu1 %v200_v10  ;;  %95 = vadd.xlane.f32.xlu0 %v94_v11 }
  0x69   :  { %v126_v3 = vpop.permute.xlu2 %125 }
  0x83   :  { %v138_v12 = vpop.xlane.xlu1 %137  ;;  %v78_v13 = vpop.xlane.xlu0 %77 }
  0x84   :  { %v139_v14 = vmax.f32 %v138_v12, 1e-24  ;;  %v79_v15 = vmax.f32 %v78_v13, 1e-24 }
  0x86   :  { %331 = vrsqrt.f32 %v139_v14  ;;  %vm146_vm3 = vweird.f32 %v139_v14  ;;  %vm86_vm4 = vweird.f32 %v79_v15 }
  0x87   :  { %333 = vrsqrt.f32 %v79_v15 }
  0x8b   :  { %v202_v16 = vpop.xlane.xlu1 %201  ;;  %v96_v17 = vpop.xlane.xlu0 %95 }
  0x8c   :  { %v332_v19 = vpop.eup %331  ;;  %v203_v20 = vmax.f32 %v202_v16, 1e-24  ;;  %v97_v21 = vmax.f32 %v96_v17, 1e-24  ;;  %v182_v16 = vld [vmem:[#allocation5] sm:$0xff]  ;;  %v190_v17 = vld [vmem:[#allocation4] sm:$0xff] }
  0x8d   :  { %v334_v23 = vpop.eup %333  ;;  %v141_v24 = vmul.f32 %v332_v19, %v139_v14  ;;  %vm147_vm1 = vweird.f32 %v332_v19 }
  0x8e   :  { %v81_v25 = vmul.f32 %v334_v23, %v79_v15  ;;  %335 = vrsqrt.f32 %v203_v20  ;;  %vm87_vm2 = vweird.f32 %v334_v23  ;;  %vm148_vm5 = vmor %vm146_vm3, %vm147_vm1  ;;  %vm210_vm9 = vweird.f32 %v203_v20 }
  0x8f   :  { %v142_v26 = vmul.f32 %v332_v19, %v141_v24  ;;  %337 = vrsqrt.f32 %v97_v21  ;;  %vm88_vm6 = vmor %vm86_vm4, %vm87_vm2  ;;  %vm104_vm10 = vweird.f32 %v97_v21 }
  0x90   :  { %v82_v27 = vmul.f32 %v334_v23, %v81_v25 }
  0x91   :  { %v143_v28 = vmul.f32 0.5, %v142_v26 }
  0x92   :  { %v83_v29 = vmul.f32 0.5, %v82_v27  ;;  %v252_v27 = vld [vmem:[#allocation6] sm:$0xff] }
  0x93   :  { %v144_v30 = vsub.f32 1.5, %v143_v28 }
  0x94   :  { %v336_v31 = vpop.eup %335  ;;  %v84_v32 = vsub.f32 1.5, %v83_v29 }
  0x95   :  { %v338_v33 = vpop.eup %337  ;;  %v205_v34 = vmul.f32 %v336_v31, %v203_v20  ;;  %v145_v35 = vmul.f32 %v332_v19, %v144_v30  ;;  %vm211_vm7 = vweird.f32 %v336_v31 }
  0x96   :  { %v85_v36 = vmul.f32 %v334_v23, %v84_v32  ;;  %v99_v37 = vmul.f32 %v338_v33, %v97_v21  ;;  %vm105_vm8 = vweird.f32 %v338_v33  ;;  %vm212_vm11 = vmor %vm210_vm9, %vm211_vm7 }
  0x97   :  { %v206_v38 = vmul.f32 %v336_v31, %v205_v34  ;;  %v149_v39 = vsel %vm148_vm5, %v332_v19, %v145_v35  ;;  %vm106_vm12 = vmor %vm104_vm10, %vm105_vm8 }
  0x98   :  { %v89_v40 = vsel %vm88_vm6, %v334_v23, %v85_v36  ;;  %v100_v41 = vmul.f32 %v338_v33, %v99_v37  ;;  %v150_v42 = vmul.f32 %v149_v39, %v133_v0  ;;  %v246_v23 = vld [vmem:[#allocation7] sm:$0xff] }
  0x99   :  { %v90_v43 = vmul.f32 %v89_v40, %v73_v1  ;;  %v207_v44 = vmul.f32 0.5, %v206_v38  ;;  %v330_v1 = vld [vmem:[%s523_s1] ss:$0 sm:$0xff] }
  0x9a   :  { %v101_v45 = vmul.f32 0.5, %v100_v41  ;;  %317 = vmatpush.xpose.msk.msra.mxu0 %vm75_vm0, %v150_v42  ;;  %vm131_vm15 = vcmp.eq.f32.partialorder %v126_v3, %v330_v1 }
  0x9b   :  { %91 = vst.msk [vmem:[#allocation2] sm:$0xff] %vm75_vm0, %v90_v43  ;;  %v208_v46 = vsub.f32 1.5, %v207_v44 }
  0x9c   :  { %v102_v47 = vsub.f32 1.5, %v101_v45 }
  0x9d   :  { %v209_v48 = vmul.f32 %v336_v31, %v208_v46 }
  0x9e   :  { %v103_v49 = vmul.f32 %v338_v33, %v102_v47 }
  0x9f   :  { %v213_v50 = vsel %vm212_vm11, %v336_v31, %v209_v48 }
  0xa0   :  { %v107_v51 = vsel %vm106_vm12, %v338_v33, %v103_v49  ;;  %v214_v52 = vmul.f32 %v213_v50, %v479_v4 }
  0xa1   :  { %v108_v53 = vmul.f32 %v107_v51, %v481_v5 }
  0xa2   :  { %v132_v54 = vld [vmem:[#allocation2] sm:$0xff]  ;;  %320 = vmatpush.xpose.msk.msra.mxu1 %vm75_vm0, %v214_v52 }
  0xa3   :  { %109 = vst.msk [vmem:[#allocation3] sm:$0xff] %vm75_vm0, %v108_v53  ;;  %318 = vmatmul.msk.f32.vlgmr.msra.gmra.mxu0 %vm75_vm0, %v132_v54 }
  0xaa   :  { %v197_v55 = vld [vmem:[#allocation3] sm:$0xff] }
  0xab   :  { %321 = vmatmul.msk.f32.vlgmr.msra.gmra.mxu1 %vm75_vm0, %v197_v55  ;;  %vm183_vm0 = vcmask 64512  }
 0x120   :  { %v174_v56 = vpop.f32.mrf.mxu0 }
 0x121   :  { %v319_v57 = vadd.f32 -1.0, %v174_v56 }
 0x123   :  { %v178_v59 = vmul.f32 20.0, %v319_v57  ;;  %v306_v57 = vsub.f32 1.0, %v494_v18 }
 0x125   :  { %v179_v61 = vmul.f32 1.442695, %v178_v59 }
 0x127   :  { %339 = vpow2.f32 %v179_v61  ;;  %v307_v61 = vmul.f32 0.25, %v306_v57 }
 0x128   :  { %v238_v0 = vpop.f32.mrf.mxu1 }
 0x129   :  { %v322_v2 = vadd.f32 -1.0, %v238_v0  ;;  %v308_v0 = vadd.f32 %v307_v61, %v305_v60 }
 0x12b   :  { %v242_v4 = vmul.f32 20.0, %v322_v2 }
 0x12d   :  { %v340_v5 = vpop.eup %339  ;;  %v243_v6 = vmul.f32 1.442695, %v242_v4 }
 0x12e   :  { %v181_v7 = vsel %vm120_vm14, %v340_v5, 0.0 }
 0x12f   :  { %341 = vpow2.f32 %v243_v6  ;;  %v184_v8 = vsel %vm183_vm0, %v181_v7, 0.0  ;;  %v191_v9 = vsel %vm131_vm15, %v181_v7, 0.0 }
 0x130   :  { %185 = vadd.xlane.f32.xlu2 %v184_v8  ;;  %v192_v10 = vsel %vm183_vm0, %v191_v9, 0.0 }
 0x131   :  { %193 = vadd.xlane.f32.xlu1 %v192_v10 }
 0x135   :  { %v342_v11 = vpop.eup %341 }
 0x136   :  { %v245_v12 = vsel %vm120_vm14, %v342_v11, 0.0 }
 0x137   :  { %v247_v13 = vsel %vm183_vm0, %v245_v12, 0.0  ;;  %v253_v14 = vsel %vm131_vm15, %v245_v12, 0.0 }
 0x138   :  { %248 = vadd.xlane.f32.xlu0 %v247_v13  ;;  %v254_v15 = vsel %vm183_vm0, %v253_v14, 0.0 }
 0x140   :  { %255 = vadd.xlane.f32.xlu0 %v254_v15 }
 0x1a3   :  { %v186_v19 = vpop.xlane.xlu2 %185 }
 0x1a4   :  { %v187_v20 = vadd.f32 %v186_v19, %v182_v16  ;;  %v194_v21 = vpop.xlane.xlu1 %193 }
 0x1a5   :  { %v195_v22 = vadd.f32 %v194_v21, %v190_v17 }
 0x1a6   :  { %189 = vst.msk [vmem:[#allocation5] sm:$0xff] %vm68_vm13, %v187_v20 }
 0x1a7   :  { %196 = vst.msk [vmem:[#allocation4] sm:$0xff] %vm68_vm13, %v195_v22 }
 0x1ab   :  { %v249_v24 = vpop.xlane.xlu0 %248 }
 0x1ac   :  { %v250_v25 = vadd.f32 %v249_v24, %v246_v23 }
 0x1ad   :  { %v263_v26 = vld [vmem:[#allocation5] sm:$0xff] }
 0x1ae   :  { %343 = vrcp.f32 %v263_v26  ;;  %251 = vst.msk [vmem:[#allocation7] sm:$0xff] %vm68_vm13, %v250_v25  ;;  %v275_v34 = vand.u32 2147483648, %v263_v26  ;;  %v273_v36 = vand.u32 2147483647, %v263_v26  ;;  %vm269_vm2 = vweird.f32 %v263_v26  ;;  %v262_v42 = vld [vmem:[#allocation4] sm:$0xff] }
 0x1b0   :  { %v276_v39 = vor.u32 1.1754944e-38, %v275_v34  ;;  %vm274_vm4 = vcmp.eq.f32.partialorder %v273_v36, 8.507059e+37 }
 0x1b3   :  { %v256_v28 = vpop.xlane.xlu0 %255 }
 0x1b4   :  { %v344_v29 = vpop.eup %343  ;;  %v257_v30 = vadd.f32 %v256_v28, %v252_v27 }
 0x1b5   :  { %v265_v31 = vmul.f32 %v344_v29, %v263_v26  ;;  %v284_v32 = vld [vmem:[#allocation7] sm:$0xff]  ;;  %vm270_vm1 = vweird.f32 %v344_v29 }
 0x1b6   :  { %345 = vrcp.f32 %v284_v32  ;;  %258 = vst.msk [vmem:[#allocation6] sm:$0xff] %vm68_vm13, %v257_v30  ;;  %vm271_vm3 = vmor %vm269_vm2, %vm270_vm1  ;;  %v296_v46 = vand.u32 2147483648, %v284_v32  ;;  %v294_v49 = vand.u32 2147483647, %v284_v32  ;;  %vm290_vm6 = vweird.f32 %v284_v32 }
 0x1b7   :  { %v266_v33 = vsub.f32 1.0, %v265_v31 }
 0x1b8   :  { %v297_v51 = vor.u32 1.1754944e-38, %v296_v46  ;;  %vm295_vm8 = vcmp.eq.f32.partialorder %v294_v49, 8.507059e+37 }
 0x1b9   :  { %v267_v35 = vmul.f32 %v344_v29, %v266_v33 }
 0x1bb   :  { %v268_v37 = vadd.f32 %v344_v29, %v267_v35 }
 0x1bc   :  { %v346_v38 = vpop.eup %345 }
 0x1bd   :  { %v272_v40 = vsel %vm271_vm3, %v344_v29, %v268_v37  ;;  %v286_v41 = vmul.f32 %v346_v38, %v284_v32  ;;  %vm291_vm5 = vweird.f32 %v346_v38  ;;  %v283_v53 = vld [vmem:[#allocation6] sm:$0xff] }
 0x1be   :  { %v277_v43 = vsel %vm274_vm4, %v276_v39, %v272_v40  ;;  %vm292_vm7 = vmor %vm290_vm6, %vm291_vm5 }
 0x1bf   :  { %v278_v44 = vmul.f32 %v277_v43, %v262_v42  ;;  %v287_v45 = vsub.f32 1.0, %v286_v41 }
 0x1c1   :  { %v279_v47 = vadd.f32 1e-05, %v278_v44  ;;  %v288_v48 = vmul.f32 %v346_v38, %v287_v45 }
 0x1c3   :  { %v289_v50 = vadd.f32 %v346_v38, %v288_v48  ;;  %347 = vlog2.f32 %v279_v47 }
 0x1c5   :  { %v293_v52 = vsel %vm292_vm7, %v346_v38, %v289_v50 }
 0x1c6   :  { %v298_v54 = vsel %vm295_vm8, %v297_v51, %v293_v52 }
 0x1c7   :  { %v299_v55 = vmul.f32 %v298_v54, %v283_v53 }
 0x1c9   :  { %v300_v56 = vadd.f32 1e-05, %v299_v55  ;;  %v348_v58 = vpop.eup %347 }
 0x1ca   :  { %v281_v59 = vmul.f32 0.6931472, %v348_v58 }
 0x1cb   :  { %349 = vlog2.f32 %v300_v56 }
 0x1cc   :  { %v282_v63 = vsub.f32 0.0, %v281_v59 }
 0x1d1   :  { %v350_v62 = vpop.eup %349 }
 0x1d2   :  { %v302_v1 = vmul.f32 0.6931472, %v350_v62 }
 0x1d4   :  { %v303_v2 = vsub.f32 %v282_v63, %v302_v1 }
 0x1d6   :  { %v309_v3 = vmul.f32 %v308_v0, %v303_v2 }
 0x1d8   :  { %310 = vst.msk [vmem:[%s528_s6] sm:$0xff] %vm68_vm13, %v309_v3 }
 0x1d9   :  { %315 = vsyncpa [#allocation9], 1 }
 0x1da   :  { %316 = vsyncpa [#allocation11], 1 }

</bundles_post_ra>
